<compile_context>
chip_gen: v7x
topology: tpu7x:2x2x1
jax: 0.10.0
libtpu: 0.0.40
codegen_flags: <defaults>
</compile_context>

<pallas_src>
import functools

import jax
import jax.numpy as jnp
from jax.experimental import pallas as pl
from jax.experimental.pallas import tpu as pltpu


def _sta_kernel(x_ref, w1t_ref, w2_ref, out_ref, sum_acc, max_acc, *,
                s_total, ts, chunk_w):
    # x_ref:   (1, C, tS) block of x viewed as (N, C, S=H*W); last block may be padded.
    # w1t_ref: (C, Ch)    = W1.T  (first 1x1 conv,  Ch = C // 16)
    # w2_ref:  (C, Ch)    = W2    (second 1x1 conv)
    # out_ref: (1, C, 1)  sigmoid(fc(avg) + fc(max)) for this n
    # sum_acc / max_acc: (C, chunk_w) f32 lane-wide running sum / max accumulators.
    s = pl.program_id(1)
    n_s = pl.num_programs(1)
    c = sum_acc.shape[0]

    @pl.when(s == 0)
    def _init():
        sum_acc[...] = jnp.zeros_like(sum_acc)
        max_acc[...] = jnp.full_like(max_acc, -jnp.inf)

    n_chunks = ts // chunk_w             # static >= 1
    has_tail = (s_total % ts) != 0       # static
    unroll = n_chunks <= 8

    def accumulate(rem):
        # rem: static int or None. If not None, lanes whose offset within this block is
        # >= rem are DMA padding and must not contribute to the pools.
        if rem is not None:
            # Hoisted out of the chunk loop (broadcast_in_dim is not CSE'd).
            lane = jax.lax.broadcasted_iota(jnp.int32, (c, chunk_w), 1)

        def body(k, carry):
            off = pl.multiple_of(k * chunk_w, chunk_w)
            chunk = x_ref[0, :, pl.ds(off, chunk_w)].astype(jnp.float32)   # (C, chunk_w)
            if rem is None:
                sum_chunk = chunk
                max_chunk = chunk
            else:
                valid = (off + lane) < rem
                sum_chunk = jnp.where(valid, chunk, 0.0)
                max_chunk = jnp.where(valid, chunk, -jnp.inf)
            sum_acc[...] += sum_chunk                                      # VALU only
            max_acc[...] = jnp.maximum(max_acc[...], max_chunk)            # VALU only
            return carry

        jax.lax.fori_loop(0, n_chunks, body, 0, unroll=unroll)

    if not has_tail:
        accumulate(None)
    else:
        @pl.when(s < n_s - 1)
        def _full_blocks():
            accumulate(None)

        @pl.when(s == n_s - 1)
        def _tail_block():
            accumulate(s_total - (n_s - 1) * ts)   # static remainder, 1..ts

    @pl.when(s == n_s - 1)
    def _finalize():
        inv_s = 1.0 / float(s_total)
        # Single cross-lane reduce per n (XLU), instead of one per grid step.
        avg_col = jnp.sum(sum_acc[...], axis=1, keepdims=True) * inv_s     # (C, 1)
        max_col = jnp.max(max_acc[...], axis=1, keepdims=True)             # (C, 1)
        w1t = w1t_ref[...]                                                 # (C, Ch)
        w2 = w2_ref[...]                                                   # (C, Ch)

        def fc(v_col):                                                     # v_col: (C, 1)
            # layer 1: h[i] = sum_c W1[i, c] * v[c]   -> (1, Ch)  (sublane reduce)
            h = jnp.maximum(jnp.sum(w1t * v_col, axis=0, keepdims=True), 0.0)
            # layer 2: o[c] = sum_i W2[c, i] * h[i]   -> (C, 1)   (lane reduce)
            return jnp.sum(w2 * h, axis=1, keepdims=True)

        z = fc(avg_col) + fc(max_col)                                      # (C, 1)
        out_ref[0] = (1.0 / (1.0 + jnp.exp(-z))).astype(out_ref.dtype)


def _pick_spatial_block(s_total, c, itemsize, max_block_bytes=8 << 20):
    """Spatial tile: multiple of 128 (<= s_total, <= ~8 MiB per block); full extent if tiny."""
    if s_total < 128:
        return s_total                              # full-extent last dim (always legal)
    budget = max(128, ((max_block_bytes // (c * itemsize)) // 128) * 128)
    return min((s_total // 128) * 128, budget)


def short_term_attention(x, w1, w2):
    """x: (N, C, H, W); w1: (C//16, C); w2: (C, C//16). Returns (N, C, 1, 1)."""
    n, c, h, w = x.shape
    ch = w1.shape[0]
    assert w1.shape == (ch, c) and w2.shape == (c, ch)
    s_total = h * w
    itemsize = jnp.dtype(x.dtype).itemsize
    x3 = x.reshape(n, c, s_total)                   # free view, lane-dense last dim

    ts = _pick_spatial_block(s_total, c, itemsize)
    n_s = pl.cdiv(s_total, ts)
    chunk_w = 128 if ts >= 128 else ts

    kernel = functools.partial(_sta_kernel, s_total=s_total, ts=ts, chunk_w=chunk_w)

    flops = 2 * n * c * s_total + 8 * n * c * ch            # sum+max streaming, tiny MLP
    bytes_accessed = n * c * s_total * itemsize + 2 * c * ch * 4 + n * c * itemsize

    out = pl.pallas_call(
        kernel,
        out_shape=jax.ShapeDtypeStruct((n, c, 1), x.dtype),
        grid_spec=pltpu.PrefetchScalarGridSpec(
            num_scalar_prefetch=0,
            grid=(n, n_s),
            in_specs=[
                pl.BlockSpec((1, c, ts), lambda i, j: (i, 0, j)),
                pl.BlockSpec((c, ch), lambda i, j: (0, 0)),   # VMEM-resident weights
                pl.BlockSpec((c, ch), lambda i, j: (0, 0)),
            ],
            out_specs=pl.BlockSpec((1, c, 1), lambda i, j: (i, 0, 0)),
            scratch_shapes=[
                pltpu.VMEM((c, chunk_w), jnp.float32),        # lane-wide sum accumulator
                pltpu.VMEM((c, chunk_w), jnp.float32),        # lane-wide max accumulator
            ],
        ),
        compiler_params=pltpu.CompilerParams(
            dimension_semantics=("parallel", "arbitrary"),
            # Explicit: v5e's default scoped-VMEM limit (16 MiB) would not fit
            # 8 MiB blocks x 2 pipeline buffers. 32 MiB is safe on v5e/v6e/v7x.
            vmem_limit_bytes=32 * 1024 * 1024,
        ),
        cost_estimate=pl.CostEstimate(
            flops=flops, transcendentals=n * c, bytes_accessed=bytes_accessed),
    )(x3, w1.T.astype(jnp.float32), w2.astype(jnp.float32))
    return out.reshape(n, c, 1, 1)


# ----------------------------------------------------------------------------
# Pure-JAX reference (mirrors the PyTorch forward) for validation.
# ----------------------------------------------------------------------------
def reference(x, w1, w2):
    avg = jnp.mean(x, axis=(2, 3))                          # (N, C)
    mx = jnp.max(x, axis=(2, 3))                            # (N, C)

    def fc(v):
        return jnp.maximum(v @ w1.T, 0.0) @ w2.T            # (N, C)

    out = jax.nn.sigmoid(fc(avg) + fc(mx))
    return out[:, :, None, None]


if __name__ == "__main__":
    key = jax.random.PRNGKey(0)
    c = 32                                                  # in_planes=32 -> hidden = 32//16 = 2
    ch = c // 16
    ks = jax.random.split(key, 8)
    # Conv2d(C, C//16, 1, bias=False) / Conv2d(C//16, C, 1, bias=False) weights (1x1 -> matrices).
    w1 = jax.random.normal(ks[0], (ch, c), jnp.float32) * 0.17
    w2 = jax.random.normal(ks[1], (c, ch), jnp.float32) * 0.7

    # Main case + a non-128-divisible spatial size (masked tail) + a tiny spatial size.
    shapes = [(2, c, 16, 16), (2, c, 10, 17), (1, c, 8, 8)]
    for idx, shp in enumerate(shapes):
        x = jax.random.normal(ks[2 + idx], shp, jnp.float32)
        out = jax.block_until_ready(short_term_attention(x, w1, w2))
        ref = reference(x, w1, w2)
        assert out.shape == (shp[0], c, 1, 1)
        assert jnp.allclose(out, ref, atol=1e-5, rtol=1e-5), f"mismatch for shape {shp}"
    print("KERNEL_OK")
</pallas_src>

<mosaic_0001>
module attributes {stable_mosaic.version = 11 : i64} {
  func.func @_sta_kernel(%arg0: i32, %arg1: i32, %arg2: memref<1x32x256xf32, #tpu.memory_space<vmem>>, %arg3: memref<32x2xf32, #tpu.memory_space<vmem>>, %arg4: memref<32x2xf32, #tpu.memory_space<vmem>>, %arg5: memref<1x32x1xf32, #tpu.memory_space<vmem>>, %arg6: memref<32x128xf32, #tpu.memory_space<vmem>>, %arg7: memref<32x128xf32, #tpu.memory_space<vmem>>) attributes {dimension_semantics = [#tpu.dimension_semantics<parallel>, #tpu.dimension_semantics<arbitrary>], iteration_bounds = array<i64: 2, 1>, scalar_prefetch = 0 : i64, scratch_operands = 2 : i64, tpu.core_type = #tpu.core_type<tc>, window_params = [{transform_indices = @transform_0, window_bounds = array<i64: 1, 32, 256>}, {pipeline_mode = #tpu.pipeline_mode<synchronous>, transform_indices = @transform_1, window_bounds = array<i64: 32, 2>}, {pipeline_mode = #tpu.pipeline_mode<synchronous>, transform_indices = @transform_2, window_bounds = array<i64: 32, 2>}, {transform_indices = @transform_3, window_bounds = array<i64: 1, 32, 1>}]} {
    %c0_i32 = arith.constant 0 : i32
    %0 = arith.cmpi eq, %arg1, %c0_i32 : i32
    %1 = arith.extui %0 : i1 to i32
    %c0_i32_0 = arith.constant 0 : i32
    %2 = arith.cmpi ne, %1, %c0_i32_0 : i32
    scf.if %2 {
      %cst = arith.constant 0.000000e+00 : f32
      %28 = vector.broadcast %cst : f32 to vector<32x128xf32>
      %c0_24 = arith.constant 0 : index
      %c0_25 = arith.constant 0 : index
      %29 = vector.load %arg6[%c0_24, %c0_25] : memref<32x128xf32, #tpu.memory_space<vmem>>, vector<32x128xf32>
      tpu.vector_store %arg6[%c0_24, %c0_25], %28 {strides = array<i32>} : memref<32x128xf32, #tpu.memory_space<vmem>>, vector<32x128xf32>,
      %cst_26 = arith.constant 0xFF800000 : f32
      %30 = vector.broadcast %cst_26 : f32 to vector<32x128xf32>
      %c0_27 = arith.constant 0 : index
      %c0_28 = arith.constant 0 : index
      %31 = vector.load %arg7[%c0_27, %c0_28] : memref<32x128xf32, #tpu.memory_space<vmem>>, vector<32x128xf32>
      tpu.vector_store %arg7[%c0_27, %c0_28], %30 {strides = array<i32>} : memref<32x128xf32, #tpu.memory_space<vmem>>, vector<32x128xf32>,
    } else {
    }
    %c0_i32_1 = arith.constant 0 : i32
    %c128_i32 = arith.constant 128 : i32
    %3 = arith.muli %c0_i32_1, %c128_i32 : i32
    %4 = tpu.assume_multiple %3, 128 : i32
    %c0 = arith.constant 0 : index
    %c0_2 = arith.constant 0 : index
    %5 = arith.index_cast %4 : i32 to index
    %6 = vector.load %arg2[%c0, %c0_2, %5] : memref<1x32x256xf32, #tpu.memory_space<vmem>>, vector<1x32x128xf32>
    %7 = vector.shape_cast %6 : vector<1x32x128xf32> to vector<32x128xf32>
    %c0_3 = arith.constant 0 : index
    %c0_4 = arith.constant 0 : index
    %8 = vector.load %arg6[%c0_3, %c0_4] : memref<32x128xf32, #tpu.memory_space<vmem>>, vector<32x128xf32>
    %9 = arith.addf %8, %7 : vector<32x128xf32>
    %c0_5 = arith.constant 0 : index
    %c0_6 = arith.constant 0 : index
    %10 = vector.load %arg6[%c0_5, %c0_6] : memref<32x128xf32, #tpu.memory_space<vmem>>, vector<32x128xf32>
    tpu.vector_store %arg6[%c0_5, %c0_6], %9 {strides = array<i32>} : memref<32x128xf32, #tpu.memory_space<vmem>>, vector<32x128xf32>,
    %c0_7 = arith.constant 0 : index
    %c0_8 = arith.constant 0 : index
    %11 = vector.load %arg7[%c0_7, %c0_8] : memref<32x128xf32, #tpu.memory_space<vmem>>, vector<32x128xf32>
    %12 = arith.maximumf %11, %7 : vector<32x128xf32>
    %c0_9 = arith.constant 0 : index
    %c0_10 = arith.constant 0 : index
    %13 = vector.load %arg7[%c0_9, %c0_10] : memref<32x128xf32, #tpu.memory_space<vmem>>, vector<32x128xf32>
    tpu.vector_store %arg7[%c0_9, %c0_10], %12 {strides = array<i32>} : memref<32x128xf32, #tpu.memory_space<vmem>>, vector<32x128xf32>,
    %c1_i32 = arith.constant 1 : i32
    %c128_i32_11 = arith.constant 128 : i32
    %14 = arith.muli %c1_i32, %c128_i32_11 : i32
    %15 = tpu.assume_multiple %14, 128 : i32
    %c0_12 = arith.constant 0 : index
    %c0_13 = arith.constant 0 : index
    %16 = arith.index_cast %15 : i32 to index
    %17 = vector.load %arg2[%c0_12, %c0_13, %16] : memref<1x32x256xf32, #tpu.memory_space<vmem>>, vector<1x32x128xf32>
    %18 = vector.shape_cast %17 : vector<1x32x128xf32> to vector<32x128xf32>
    %c0_14 = arith.constant 0 : index
    %c0_15 = arith.constant 0 : index
    %19 = vector.load %arg6[%c0_14, %c0_15] : memref<32x128xf32, #tpu.memory_space<vmem>>, vector<32x128xf32>
    %20 = arith.addf %19, %18 : vector<32x128xf32>
    %c0_16 = arith.constant 0 : index
    %c0_17 = arith.constant 0 : index
    %21 = vector.load %arg6[%c0_16, %c0_17] : memref<32x128xf32, #tpu.memory_space<vmem>>, vector<32x128xf32>
    tpu.vector_store %arg6[%c0_16, %c0_17], %20 {strides = array<i32>} : memref<32x128xf32, #tpu.memory_space<vmem>>, vector<32x128xf32>,
    %c0_18 = arith.constant 0 : index
    %c0_19 = arith.constant 0 : index
    %22 = vector.load %arg7[%c0_18, %c0_19] : memref<32x128xf32, #tpu.memory_space<vmem>>, vector<32x128xf32>
    %23 = arith.maximumf %22, %18 : vector<32x128xf32>
    %c0_20 = arith.constant 0 : index
    %c0_21 = arith.constant 0 : index
    %24 = vector.load %arg7[%c0_20, %c0_21] : memref<32x128xf32, #tpu.memory_space<vmem>>, vector<32x128xf32>
    tpu.vector_store %arg7[%c0_20, %c0_21], %23 {strides = array<i32>} : memref<32x128xf32, #tpu.memory_space<vmem>>, vector<32x128xf32>,
    %c2_i32 = arith.constant 2 : i32
    %c0_i32_22 = arith.constant 0 : i32
    %25 = arith.cmpi eq, %arg1, %c0_i32_22 : i32
    %26 = arith.extui %25 : i1 to i32
    %c0_i32_23 = arith.constant 0 : i32
    %27 = arith.cmpi ne, %26, %c0_i32_23 : i32
    scf.if %27 {
      %c0_24 = arith.constant 0 : index
      %c0_25 = arith.constant 0 : index
      %28 = vector.load %arg6[%c0_24, %c0_25] : memref<32x128xf32, #tpu.memory_space<vmem>>, vector<32x128xf32>
      %cst = arith.constant dense<0.000000e+00> : vector<32xf32>
      %29 = vector.multi_reduction <add>, %28, %cst [1] : vector<32x128xf32> to vector<32xf32>
      %30 = vector.shape_cast %29 : vector<32xf32> to vector<32x1xf32>
      %cst_26 = arith.constant 3.906250e-03 : f32
      %31 = vector.broadcast %cst_26 : f32 to vector<32x1xf32>
      %32 = arith.mulf %30, %31 : vector<32x1xf32>
      %c0_27 = arith.constant 0 : index
      %c0_28 = arith.constant 0 : index
      %33 = vector.load %arg7[%c0_27, %c0_28] : memref<32x128xf32, #tpu.memory_space<vmem>>, vector<32x128xf32>
      %cst_29 = arith.constant dense<0xFF800000> : vector<32xf32>
      %34 = vector.multi_reduction <maximumf>, %33, %cst_29 [1] : vector<32x128xf32> to vector<32xf32>
      %35 = vector.shape_cast %34 : vector<32xf32> to vector<32x1xf32>
      %c0_30 = arith.constant 0 : index
      %c0_31 = arith.constant 0 : index
      %36 = vector.load %arg3[%c0_30, %c0_31] : memref<32x2xf32, #tpu.memory_space<vmem>>, vector<32x2xf32>
      %c0_32 = arith.constant 0 : index
      %c0_33 = arith.constant 0 : index
      %37 = vector.load %arg4[%c0_32, %c0_33] : memref<32x2xf32, #tpu.memory_space<vmem>>, vector<32x2xf32>
      %38 = vector.broadcast %32 : vector<32x1xf32> to vector<32x2xf32>
      %39 = arith.mulf %36, %38 : vector<32x2xf32>
      %cst_34 = arith.constant dense<0.000000e+00> : vector<2xf32>
      %40 = vector.multi_reduction <add>, %39, %cst_34 [0] : vector<32x2xf32> to vector<2xf32>
      %41 = vector.shape_cast %40 : vector<2xf32> to vector<1x2xf32>
      %cst_35 = arith.constant 0.000000e+00 : f32
      %42 = vector.broadcast %cst_35 : f32 to vector<1x2xf32>
      %43 = arith.maximumf %41, %42 : vector<1x2xf32>
      %44 = vector.broadcast %43 : vector<1x2xf32> to vector<32x2xf32>
      %45 = arith.mulf %37, %44 : vector<32x2xf32>
      %cst_36 = arith.constant dense<0.000000e+00> : vector<32xf32>
      %46 = vector.multi_reduction <add>, %45, %cst_36 [1] : vector<32x2xf32> to vector<32xf32>
      %47 = vector.shape_cast %46 : vector<32xf32> to vector<32x1xf32>
      %48 = vector.broadcast %35 : vector<32x1xf32> to vector<32x2xf32>
      %49 = arith.mulf %36, %48 : vector<32x2xf32>
      %cst_37 = arith.constant dense<0.000000e+00> : vector<2xf32>
      %50 = vector.multi_reduction <add>, %49, %cst_37 [0] : vector<32x2xf32> to vector<2xf32>
      %51 = vector.shape_cast %50 : vector<2xf32> to vector<1x2xf32>
      %cst_38 = arith.constant 0.000000e+00 : f32
      %52 = vector.broadcast %cst_38 : f32 to vector<1x2xf32>
      %53 = arith.maximumf %51, %52 : vector<1x2xf32>
      %54 = vector.broadcast %53 : vector<1x2xf32> to vector<32x2xf32>
      %55 = arith.mulf %37, %54 : vector<32x2xf32>
      %cst_39 = arith.constant dense<0.000000e+00> : vector<32xf32>
      %56 = vector.multi_reduction <add>, %55, %cst_39 [1] : vector<32x2xf32> to vector<32xf32>
      %57 = vector.shape_cast %56 : vector<32xf32> to vector<32x1xf32>
      %58 = arith.addf %47, %57 : vector<32x1xf32>
      %cst_40 = arith.constant 0.000000e+00 : f32
      %59 = vector.broadcast %cst_40 : f32 to vector<32x1xf32>
      %60 = arith.subf %59, %58 : vector<32x1xf32>
      %61 = math.exp %60 : vector<32x1xf32>
      %cst_41 = arith.constant 1.000000e+00 : f32
      %62 = vector.broadcast %cst_41 : f32 to vector<32x1xf32>
      %63 = arith.addf %62, %61 : vector<32x1xf32>
      %cst_42 = arith.constant 1.000000e+00 : f32
      %64 = vector.broadcast %cst_42 : f32 to vector<32x1xf32>
      %65 = arith.divf %64, %63 : vector<32x1xf32>
      %c0_43 = arith.constant 0 : index
      %c0_44 = arith.constant 0 : index
      %c0_45 = arith.constant 0 : index
      %66 = vector.load %arg5[%c0_43, %c0_44, %c0_45] : memref<1x32x1xf32, #tpu.memory_space<vmem>>, vector<1x32x1xf32>
      %67 = vector.shape_cast %66 : vector<1x32x1xf32> to vector<32x1xf32>
      %68 = vector.shape_cast %65 : vector<32x1xf32> to vector<1x32x1xf32>
      tpu.vector_store %arg5[%c0_43, %c0_44, %c0_45], %68 {strides = array<i32>} : memref<1x32x1xf32, #tpu.memory_space<vmem>>, vector<1x32x1xf32>,
    } else {
    }
    return
  }
  func.func @transform_0(%arg0: i32, %arg1: i32) -> (i32, i32, i32) {
    %c0_i32 = arith.constant 0 : i32
    %c0_i32_0 = arith.constant 0 : i32
    return %arg0, %c0_i32, %arg1 : i32, i32, i32
  }
  func.func @transform_1(%arg0: i32, %arg1: i32) -> (i32, i32) {
    %c0_i32 = arith.constant 0 : i32
    %c0_i32_0 = arith.constant 0 : i32
    %c0_i32_1 = arith.constant 0 : i32
    return %c0_i32, %c0_i32_0 : i32, i32
  }
  func.func @transform_2(%arg0: i32, %arg1: i32) -> (i32, i32) {
    %c0_i32 = arith.constant 0 : i32
    %c0_i32_0 = arith.constant 0 : i32
    %c0_i32_1 = arith.constant 0 : i32
    return %c0_i32, %c0_i32_0 : i32, i32
  }
  func.func @transform_3(%arg0: i32, %arg1: i32) -> (i32, i32, i32) {
    %c0_i32 = arith.constant 0 : i32
    %c0_i32_0 = arith.constant 0 : i32
    %c0_i32_1 = arith.constant 0 : i32
    return %arg0, %c0_i32, %c0_i32_0 : i32, i32, i32
  }
}

</mosaic_0001>

<bundles_post_ra>
// kernel: tpu_custom_call.1
= control target key start
LH: loop header
LB: loop body
LE: loop exit
PB: predicated region body
PF: predicated region fallthrough
CT: control target
= control target key end

     0   :  { %8 = vsyncpa [#allocation5], 0  ;;  %s857_s0 = inlined_call_operand.hbm [shape: f32[2,32,256], index: 0, kind: input, shape index: {}]   ;;  %s858_s1 = inlined_call_operand.vmem [shape: f32[32,2], index: 1, kind: input, shape index: {}]   ;;  %s859_s2 = inlined_call_operand.vmem [shape: f32[32,2], index: 2, kind: input, shape index: {}]   ;;  %s860_s3 = inlined_call_operand.vmem [shape: f32[2,32,1], index: 3, kind: output, shape index: {}]  }
   0x1   :  { %10 = vsyncpa [#allocation5 + $0x1], 0  ;;  %s693_s12 = smov 0   ;;  %s695_s13 = smov 0  }
   0x2   :  { %s697_s14 = smov 0   ;;  %s699_s15 = smov 0  }
   0x3   :  { %s701_s16 = smov 0   ;;  %s703_s17 = smov 0  }
   0x4 LB: > { %s496_s18 = sadd.s32 4294967295, %s668_s17   ;;  %s28_s19 = sadd.s32 1, %s664_s16  ;;  %s668_s17 = sphi %s703_s17, %s16_s17   ;;  %s664_s16 = sphi %s701_s16, %s868_s16   ;;  %s660_s15 = sphi %s699_s15, %s867_s15   ;;  %s656_s14 = sphi %s697_s14, %s866_s14   ;;  %s652_s13 = sphi %s695_s13, %s865_s13   ;;  %s648_s12 = sphi %s693_s12, %s864_s12  }
   0x5   : > { %p30_p0 = scmp.ge.s32.totalorder %s28_s19, 2  ;;  %s37_s20 = sadd.s32 1, %s656_s14 }
   0x6   : > { %p44_p1 = scmp.ne.s32.totalorder %s656_s14, %s652_s13  ;;  %p45_p2 = scmp.eq.s32.totalorder %s668_s17, 0 }
   0x7   : > { %s870_s19 = smov (%p30_p0, %s28_s19), 0  ;;  %p50_p4 = scmp.ne.s32.totalorder %s652_s13, %s648_s12 }
   0x8   : > { %p729_p3 = por %p45_p2, %p44_p1  ;;  %s32_s22 = ssub.s32 %s664_s16, %s870_s19 }
   0x9   : > { %p51_p5 = scmp.eq.s32.totalorder %s496_s18, 0  ;;  %p35_p6 = scmp.eq.s32.totalorder %s32_s22, 0 }
   0xa   : > { %p521_p8 = scmp.lt.s32.totalorder %s668_s17, 2  ;;  %s148_s25 = sand.u32 1, %s656_s14  }
   0xb   : > { %p736_p7 = por %p51_p5, %p50_p4  ;;  %s513_s26 = sshll.u32 %s664_s16, 10 }
   0xc   : > { %s742_s24 = scalar_select %p35_p6, %s656_s14, %s37_s20  }
   0xd   : > { %s500_s27 = sshll.u32 %s148_s25, 6  ;;  %s749_s30 = scalar_lea.hbm %s857_s0, %s513_s26 }
   0xe   : > { %s152_s4 = scalar_lea.vmem [#allocation4], %s500_s27  ;;  %p753_p9 = pnand %p521_p8, %p729_p3 }
   0xf   : > { %s161_s5 = sshll.u32 %s152_s4, 4  ;;  %s759_s7 = scalar_lea.sflag [#allocation5], %s148_s25  ;;  %s757_s5 = int_to_ptr.vmem [resolvable:$true] %s161_s5 }
  0x10   : > { %s588_s8 = scalar_lea.hbm %s749_s30, 1024  ;;  %p590_p11 = pneg %p753_p9 }
  0x11   : > { %p589_p10 = scmp.ne.s32.totalorder %s749_s30, %s588_s8  ;;  %s593_s11 = scalar_lea.hbm %s857_s0, 2048 }
  0x12   : > { %p594_p0 = scmp.lt.u32.totalorder %s749_s30, %s857_s0  ;;  %p595_p1 = scmp.lt.u32.totalorder %s593_s11, %s588_s8 }
  0x13   : > { %p591_p12 = pnand %p590_p11, %p589_p10  ;;  %p597_p3 = scmp.lt.u32.totalorder %s588_s8, %s749_s30 }
  0x14   : > { %p596_p2 = por %p595_p1, %p594_p0 }
  0x15   : > { %p592_p13 = pneg %p591_p12 }
  0x16   : > { %p598_p4 = por %p597_p3, %p596_p2 }
  0x18   : > { %p599_p5 = pnand %p598_p4, %p592_p13 }
  0x1a   : > { %602 = shalt.err (!%p599_p5)
}
  0x1b   : > { %s603_s20 = scalar_lea.vmem %s757_s5, 1024  ;;  %s670_s21 = smov [#allocation4]  }
  0x1c   : > { %p604_p6 = scmp.ne.s32.totalorder %s757_s5, %s603_s20  ;;  %s608_s22 = sshll.u32 %s670_s21, 4  ;;  %s609_s22 = int_to_ptr.vmem [resolvable:$false] %s608_s22 }
  0x1d   : > { %s610_s25 = scalar_lea.vmem %s609_s22, 2048  ;;  %p611_p12 = scmp.lt.s32.totalorder %s757_s5, %s609_s22 }
  0x1e   : > { %p606_p8 = pnand %p604_p6, %p590_p11  ;;  %p612_p0 = scmp.lt.s32.totalorder %s610_s25, %s603_s20 }
  0x20   : > { %p607_p10 = pneg %p606_p8  ;;  %p613_p1 = por %p612_p0, %p611_p12 }
  0x22   : > { %p614_p2 = pnand %p613_p1, %p607_p10 }
  0x24   : > { %617 = shalt.err (!%p614_p2)
}
  0x25   : > { %s671_s26 = smov 256   ;;  %s672_s27 = smov 16  }
  0x26   : > { %520 = dma.hbm_to_vmem [thread:$0]  (!%p753_p9), %s749_s30, 1024, %s757_s5, %s759_s7, %s671_s26, %s671_s26, %s672_s27  }
  0x27   : > { %p503_p11 = scmp.ge.s32.totalorder %s668_s17, 1  ;;  %p169_p13 = scmp.lt.s32.totalorder %s668_s17, 3 }
  0x29   : > { %p170_p3 = pnand %p503_p11, %p169_p13 }
  0x2a   : > { %s175_s28 = sand.u32 (!%p170_p3), 1, %s652_s13  }
  0x2b   : > { %173 = sbr.rel (%p170_p3) target bundleno = 419 (0x1a3), region = 32  ;;  %s504_s29 = sshll.u32 (!%p170_p3), %s175_s28, 6 }
  0x2c   : > { %s176_s4 = scalar_lea.sflag (!%p170_p3), [#allocation5], %s175_s28  ;;  %s179_s8 = scalar_lea.vmem (!%p170_p3), [#allocation4], %s504_s29 }
  0x32   : > { %643 = dma.done.wait (%p736_p7), %s176_s4, 1024  }
  0x33   : > { %645 = vsyncadd (%p736_p7), %s176_s4, 4294966272  ;;  %v222_v0 = vld [vmem:[%s179_s8 + $0x20] sm:$0xff]  ;;  %v509_v1 = vld [vmem:[%s179_s8 + $0x28] sm:$0xff]  ;;  %vm320_vm0 = vcmask 15360   ;;  %p203_p7 = scmp.lt.s32.totalorder %s660_s15, 1  ;;  %vm413_vm1 = vcmask 7168  }
  0x34   : > { %v220_v2 = vld [vmem:[%s179_s8] sm:$0xff]  ;;  %v259_v3 = vadd.f32 %v509_v1, %v222_v0  ;;  %v507_v4 = vld [vmem:[%s179_s8 + $0x8] sm:$0xff]  ;;  %v221_v5 = vld [vmem:[%s179_s8 + $0x10] sm:$0xff]  ;;  %v271_v15 = vmax.f32 %v222_v0, %v509_v1 }
  0x35   : > { %v508_v6 = vld [vmem:[%s179_s8 + $0x18] sm:$0xff]  ;;  %v257_v7 = vadd.f32 %v507_v4, %v220_v2  ;;  %v269_v8 = vmax.f32 %v220_v2, %v507_v4  ;;  %v223_v10 = vld [vmem:[%s179_s8 + $0x30] sm:$0xff]  ;;  %v308_v19 = vld [vmem:[%s858_s1] sm:$0xff]  ;;  %s872_s15 = smov (!%p203_p7, %s660_s15), 1 }
  0x36   : > { %288 = vadd.xlane.f32.xlu1 %v259_v3  ;;  %v258_v9 = vadd.f32 %v508_v6, %v221_v5  ;;  %v510_v11 = vld [vmem:[%s179_s8 + $0x38] sm:$0xff]  ;;  %v270_v13 = vmax.f32 %v221_v5, %v508_v6  ;;  %v309_v23 = vld [vmem:[%s858_s1 + $0x8] sm:$0xff]  ;;  %v310_v24 = vld [vmem:[%s858_s1 + $0x10] sm:$0xff]  ;;  %s514_s28 = sshll.u32 %s872_s15, 5 }
  0x37   : > { %284 = vadd.xlane.f32.xlu0 %v257_v7  ;;  %v260_v12 = vadd.f32 %v510_v11, %v223_v10  ;;  %v272_v14 = vmax.f32 %v223_v10, %v510_v11  ;;  %v311_v30 = vld [vmem:[%s858_s1 + $0x18] sm:$0xff]  ;;  %v313_v4 = vld [vmem:[%s859_s2 + $0x8] sm:$0xff]  ;;  %v312_v5 = vld [vmem:[%s859_s2] sm:$0xff]  ;;  %s207_s8 = scalar_lea.vmem %s860_s3, %s514_s28 }
  0x3a   : > { %300 = vmax.xlane.f32.xlu1 %v269_v8 }
  0x3b   : > { %286 = vadd.xlane.f32.xlu0 %v258_v9 }
  0x3e   : > { %290 = vadd.xlane.f32.xlu1 %v260_v12  ;;  %v315_v12 = vld [vmem:[%s859_s2 + $0x18] sm:$0xff] }
  0x3f   : > { %302 = vmax.xlane.f32.xlu0 %v270_v13  ;;  %v314_v13 = vld [vmem:[%s859_s2 + $0x10] sm:$0xff] }
  0x42   : > { %306 = vmax.xlane.f32.xlu1 %v272_v14 }
  0x43   : > { %304 = vmax.xlane.f32.xlu0 %v271_v15 }
  0xc3   : > { %v289_v16 = vpop.xlane.xlu1 %288 }
  0xc4   : > { %v285_v17 = vpop.xlane.xlu0 %284  ;;  %v294_v20 = vmul.f32 0.00390625, %v289_v16 }
  0xc5   : > { %v292_v18 = vmul.f32 0.00390625, %v285_v17 }
  0xc6   : > { %v318_v29 = vmul.f32 %v310_v24, %v294_v20 }
  0xc7   : > { %v301_v21 = vpop.xlane.xlu1 %300  ;;  %v316_v25 = vmul.f32 %v308_v19, %v292_v18 }
  0xc8   : > { %v287_v22 = vpop.xlane.xlu0 %286  ;;  %v351_v34 = vmul.f32 %v308_v19, %v301_v21  ;;  %v324_v40 = vsel %vm320_vm0, %v318_v29, 0.0 }
  0xc9   : > { %v293_v26 = vmul.f32 0.00390625, %v287_v22  ;;  %v321_v33 = vsel %vm320_vm0, %v316_v25, 0.0 }
  0xca   : > { %v355_v46 = vsel %vm320_vm0, %v351_v34, 0.0 }
  0xcb   : > { %v291_v27 = vpop.xlane.xlu1 %290  ;;  %v317_v28 = vmul.f32 %v309_v23, %v293_v26 }
  0xcc   : > { %v295_v31 = vmul.f32 0.00390625, %v291_v27  ;;  %v303_v32 = vpop.xlane.xlu0 %302 }
  0xcd   : > { %v322_v35 = vsel %vm320_vm0, %v317_v28, 0.0  ;;  %v352_v36 = vmul.f32 %v309_v23, %v303_v32 }
  0xce   : > { %v323_v37 = vadd.f32 %v322_v35, %v321_v33  ;;  %v319_v38 = vmul.f32 %v311_v30, %v295_v31 }
  0xcf   : > { %v356_v39 = vsel %vm320_vm0, %v352_v36, 0.0  ;;  %v307_v41 = vpop.xlane.xlu1 %306 }
  0xd0   : > { %v325_v42 = vadd.f32 %v324_v40, %v323_v37  ;;  %v305_v43 = vpop.xlane.xlu0 %304  ;;  %v326_v44 = vsel %vm320_vm0, %v319_v38, 0.0  ;;  %v354_v45 = vmul.f32 %v311_v30, %v307_v41  ;;  %v357_v48 = vadd.f32 %v356_v39, %v355_v46 }
  0xd1   : > { %v353_v47 = vmul.f32 %v310_v24, %v305_v43 }
  0xd2   : > { %v327_v49 = vadd.f32 %v326_v44, %v325_v42  ;;  %v360_v51 = vsel %vm320_vm0, %v354_v45, 0.0 }
  0xd3   : > { %v358_v50 = vsel %vm320_vm0, %v353_v47, 0.0 }
  0xd4   : > { %v359_v52 = vadd.f32 %v358_v50, %v357_v48  ;;  %v328_v53 = vrot.slane %v327_v49, 4 }
  0xd6   : > { %v329_v54 = vadd.f32 %v328_v53, %v327_v49  ;;  %v361_v55 = vadd.f32 %v360_v51, %v359_v52 }
  0xd8   : > { %v330_v56 = vrot.slane %v329_v54, 2  ;;  %v362_v57 = vrot.slane %v361_v55, 4 }
  0xda   : > { %v331_v58 = vadd.f32 %v330_v56, %v329_v54  ;;  %v363_v59 = vadd.f32 %v362_v57, %v361_v55 }
  0xdc   : > { %v332_v60 = vrot.slane %v331_v58, 1  ;;  %v364_v61 = vrot.slane %v363_v59, 2 }
  0xde   : > { %v365_v62 = vadd.f32 %v364_v61, %v363_v59  ;;  %v333_v0 = vadd.f32 %v332_v60, %v331_v58 }
  0xe0   : > { %v366_v63 = vrot.slane %v365_v62, 1  ;;  %v334_v3 = vmax.f32 %v333_v0, 0.0 }
  0xe2   : > { %v367_v1 = vadd.f32 %v366_v63, %v365_v62  ;;  %v336_v10 = vmul.f32 %v334_v3, %v313_v4  ;;  %v335_v11 = vmul.f32 %v334_v3, %v312_v5  ;;  %v338_v16 = vmul.f32 %v334_v3, %v315_v12 }
  0xe3   : > { %v337_v17 = vmul.f32 %v334_v3, %v314_v13 }
  0xe4   : > { %v368_v2 = vmax.f32 %v367_v1, 0.0  ;;  %v342_v14 = vsel %vm320_vm0, %v336_v10, 0.0  ;;  %v339_v15 = vsel %vm320_vm0, %v335_v11, 0.0  ;;  %v348_v18 = vsel %vm320_vm0, %v338_v16, 0.0 }
  0xe5   : > { %v345_v19 = vsel %vm320_vm0, %v337_v17, 0.0 }
  0xe6   : > { %v370_v6 = vmul.f32 %v368_v2, %v313_v4  ;;  %v369_v7 = vmul.f32 %v368_v2, %v312_v5  ;;  %v372_v20 = vmul.f32 %v368_v2, %v315_v12  ;;  %v371_v21 = vmul.f32 %v368_v2, %v314_v13 }
  0xe8   : > { %v376_v8 = vsel %vm320_vm0, %v370_v6, 0.0  ;;  %v373_v9 = vsel %vm320_vm0, %v369_v7, 0.0  ;;  %v382_v22 = vsel %vm320_vm0, %v372_v20, 0.0  ;;  %v379_v23 = vsel %vm320_vm0, %v371_v21, 0.0 }
  0xe9   : > { %377 = vadd.xlane.f32.xlu1 %v376_v8  ;;  %374 = vadd.xlane.f32.xlu0 %v373_v9 }
  0xed   : > { %343 = vadd.xlane.f32.xlu1 %v342_v14  ;;  %340 = vadd.xlane.f32.xlu0 %v339_v15 }
  0xf1   : > { %349 = vadd.xlane.f32.xlu1 %v348_v18  ;;  %346 = vadd.xlane.f32.xlu0 %v345_v19 }
  0xf5   : > { %383 = vadd.xlane.f32.xlu1 %v382_v22  ;;  %380 = vadd.xlane.f32.xlu0 %v379_v23 }
 0x176   : > { %v378_v24 = vpop.xlane.xlu1 %377  ;;  %v375_v25 = vpop.xlane.xlu0 %374 }
 0x17a   : > { %v344_v26 = vpop.xlane.xlu1 %343  ;;  %v341_v27 = vpop.xlane.xlu0 %340 }
 0x17b   : > { %v386_v28 = vadd.f32 %v378_v24, %v344_v26  ;;  %v385_v29 = vadd.f32 %v375_v25, %v341_v27 }
 0x17d   : > { %v390_v30 = vsub.f32 0.0, %v386_v28  ;;  %v389_v31 = vsub.f32 0.0, %v385_v29 }
 0x17e   : > { %v350_v32 = vpop.xlane.xlu1 %349  ;;  %v347_v33 = vpop.xlane.xlu0 %346 }
 0x17f   : > { %v395_v34 = vmul.f32 1.442695, %v390_v30  ;;  %v393_v35 = vmul.f32 1.442695, %v389_v31 }
 0x181   : > { %572 = vpow2.f32 %v395_v34 }
 0x182   : > { %574 = vpow2.f32 %v393_v35  ;;  %v384_v36 = vpop.xlane.xlu1 %383  ;;  %v381_v37 = vpop.xlane.xlu0 %380 }
 0x183   : > { %v388_v38 = vadd.f32 %v384_v36, %v350_v32  ;;  %v387_v39 = vadd.f32 %v381_v37, %v347_v33 }
 0x185   : > { %v392_v40 = vsub.f32 0.0, %v388_v38  ;;  %v391_v41 = vsub.f32 0.0, %v387_v39 }
 0x187   : > { %v399_v42 = vmul.f32 1.442695, %v392_v40  ;;  %v397_v43 = vmul.f32 1.442695, %v391_v41 }
 0x189   : > { %576 = vpow2.f32 %v399_v42 }
 0x18a   : > { %578 = vpow2.f32 %v397_v43 }
 0x18b   : > { %v573_v44 = vpop.eup %572 }
 0x18c   : > { %v575_v45 = vpop.eup %574  ;;  %v402_v46 = vadd.f32 1.0, %v573_v44 }
 0x18d   : > { %v401_v47 = vadd.f32 1.0, %v575_v45 }
 0x18e   : > { %580 = vrcp.f32 %v402_v46 }
 0x18f   : > { %582 = vrcp.f32 %v401_v47 }
 0x193   : > { %v577_v48 = vpop.eup %576 }
 0x194   : > { %v579_v49 = vpop.eup %578  ;;  %v404_v50 = vadd.f32 1.0, %v577_v48 }
 0x195   : > { %v403_v51 = vadd.f32 1.0, %v579_v49 }
 0x196   : > { %584 = vrcp.f32 %v404_v50 }
 0x197   : > { %586 = vrcp.f32 %v403_v51 }
 0x198   : > { %v581_v52 = vpop.eup %580 }
 0x199   : > { %v583_v53 = vpop.eup %582  ;;  %415 = vst.msk [vmem:[%s207_s8 + $0x8] sm:$0xff] %vm413_vm1, %v581_v52 }
 0x19a   : > { %414 = vst.msk [vmem:[%s207_s8] sm:$0xff] %vm413_vm1, %v583_v53 }
 0x1a0   : > { %v585_v54 = vpop.eup %584 }
 0x1a1   : > { %v587_v55 = vpop.eup %586  ;;  %417 = vst.msk [vmem:[%s207_s8 + $0x18] sm:$0xff] %vm413_vm1, %v585_v54 }
 0x1a2   : > { %416 = vst.msk [vmem:[%s207_s8 + $0x10] sm:$0xff] %vm413_vm1, %v587_v55 }
 0x1a3 PF: > { %s16_s17 = sadd.s32 1, %s668_s17   ;;  %s864_s12 = smov %s652_s13 }
 0x1a4   : > { %p13_p9 = scmp.ge.s32.totalorder %s16_s17, 4   ;;  %s865_s13 = smov %s656_s14 }
 0x1a5   : > { %s866_s14 = smov %s742_s24  ;;  %s867_s15 = smov %s664_s16 }
 0x1a6   : > { %s868_s16 = smov %s870_s19  ;;  %15 = sbr.rel (!%p13_p9) target bundleno = 4 (0x4), region = 81 }
 0x1ad   :  { %439 = vsyncpa [#allocation5], 1 }
 0x1ae   :  { %441 = vsyncpa [#allocation5 + $0x1], 1 }

</bundles_post_ra>
